<compile_context>
chip_gen: v6e
topology: v6e:2x2x1
jax: 0.10.0
libtpu: 0.0.40
codegen_flags: <defaults>
</compile_context>

<pallas_src>
import functools

import jax
import jax.numpy as jnp
from jax.experimental import pallas as pl
from jax.experimental.pallas import tpu as pltpu


def _msle_kernel(pred_ref, true_ref, mask_ref, seqlen_ref, out_ref, *,
                 sum_losses, t_total, t_ragged):
    """Processes one (row_tile, t_tile) block.  Accumulates per-row squared
    log-error sums into the resident (row_tile, 1) output block across the
    (innermost, "arbitrary") T axis."""
    j = pl.program_id(1)

    p = pred_ref[...].astype(jnp.float32)          # f32 upcast in-register
    t = true_ref[...].astype(jnp.float32)

    m = mask_ref[...]
    keep = m if m.dtype == jnp.bool_ else (m != 0)

    if t_ragged:
        # Last T tile extends past T: discard garbage columns (static flag, so
        # full-T / evenly-tiled cases pay nothing).
        tb, tt = pred_ref.shape
        col = jax.lax.broadcasted_iota(jnp.int32, (tb, tt), 1) + j * tt
        keep = keep & (col < t_total)

    # log first, then select 0 at masked positions (matches the PyTorch
    # `.log().where(mask, zeros)`; the select also drops -inf/NaN there).
    diff = jnp.where(keep, jnp.log(p) - jnp.log(t), 0.0)
    partial = jnp.sum(diff * diff, axis=-1, keepdims=True)   # [tb, 1]

    @pl.when(j == 0)
    def _init():
        out_ref[...] = jnp.zeros_like(out_ref)

    out_ref[...] += partial

    if not sum_losses:
        @pl.when(j == pl.num_programs(1) - 1)
        def _finish():
            denom = jnp.maximum(seqlen_ref[...].astype(jnp.float32), 1.0)
            out_ref[...] = out_ref[...] / denom


def msle_loss(pred_los, true_los, mask, seq_length, *, sum_losses=False,
              row_tile=None, t_tile=None,
              target_step_bytes=4 * 1024 * 1024):
    """pred_los, true_los: [B, T] floats; mask: [B, T] bool/int/float;
    seq_length: [B]. Returns a scalar float32."""
    B, T = pred_los.shape

    # --- mask: only materialize a convert when it actually saves HBM traffic.
    if mask.dtype == jnp.bool_:
        mask_in = mask                                   # already 1 B/elem
    elif (jnp.issubdtype(mask.dtype, jnp.integer)
          and jnp.dtype(mask.dtype).itemsize == 1):
        mask_in = mask                                   # int8/uint8 as-is
    else:
        mask_in = (mask != 0).astype(jnp.int8)           # float / wide int

    seqlen_f = seq_length.astype(jnp.float32).reshape(B, 1)

    bpe = (jnp.dtype(pred_los.dtype).itemsize
           + jnp.dtype(true_los.dtype).itemsize
           + jnp.dtype(mask_in.dtype).itemsize)

    # --- T (lane) tile: full T unless even a 32-row block at full T blows
    #     the per-step budget (long-sequence case).
    if t_tile is None:
        if 32 * T * bpe <= target_step_bytes:
            t_tile = T
        else:
            t_tile = max(128, (target_step_bytes // (32 * bpe) // 128) * 128)
    if t_tile >= T:
        t_tile = T
    else:
        t_tile = max(128, (t_tile // 128) * 128)   # partial-T blocks: 128-aligned
        if t_tile >= T:
            t_tile = T
    num_t = pl.cdiv(T, t_tile)
    t_ragged = (T % t_tile) != 0

    # --- row (sublane) tile from the per-step byte budget.
    if row_tile is None:
        row_tile = max(32, target_step_bytes // max(t_tile * bpe, 1))
    # keep >=2 row tiles when the batch allows it so the "parallel" row axis
    # can be split across both TensorCores on v7x.
    if B >= 64:
        half = ((-(-B // 2)) + 31) // 32 * 32
        row_tile = min(row_tile, half)
    if row_tile >= B:
        row_tile = B
    else:
        row_tile = max(32, (row_tile // 32) * 32)   # f32/bf16/int8 sublane-safe
        if row_tile >= B:
            row_tile = B
    num_rows = pl.cdiv(B, row_tile)

    # --- explicit VMEM budget: double-buffered blocks + slack for the compiler.
    step_bytes = row_tile * t_tile * bpe + row_tile * 8
    vmem_limit = min(int(2.5 * step_bytes) + (4 << 20), 120 << 20)

    kernel = functools.partial(_msle_kernel, sum_losses=sum_losses,
                               t_total=T, t_ragged=t_ragged)

    cost = pl.CostEstimate(
        flops=6 * B * T,
        transcendentals=2 * B * T,
        bytes_accessed=B * T * bpe + B * 12,
    )

    per_row = pl.pallas_call(
        kernel,
        out_shape=jax.ShapeDtypeStruct((B, 1), jnp.float32),
        grid=(num_rows, num_t),
        in_specs=[
            pl.BlockSpec((row_tile, t_tile), lambda i, j: (i, j)),   # pred
            pl.BlockSpec((row_tile, t_tile), lambda i, j: (i, j)),   # true
            pl.BlockSpec((row_tile, t_tile), lambda i, j: (i, j)),   # mask
            pl.BlockSpec((row_tile, 1), lambda i, j: (i, 0)),        # seq_length
        ],
        out_specs=pl.BlockSpec((row_tile, 1), lambda i, j: (i, 0)),
        compiler_params=pltpu.CompilerParams(
            dimension_semantics=("parallel", "arbitrary"),
            vmem_limit_bytes=vmem_limit),
        cost_estimate=cost,
    )(pred_los, true_los, mask_in, seqlen_f)

    # Tiny final mean in XLA.  The ragged last row-block's padded rows are
    # never written back (clamped DMA), so this sum only sees real rows.
    return jnp.sum(per_row) / jnp.float32(B)


def _reference(pred, true, mask, seq_length, sum_losses=False):
    mask = mask != 0
    p = jnp.where(mask, jnp.log(pred.astype(jnp.float32)), 0.0)
    t = jnp.where(mask, jnp.log(true.astype(jnp.float32)), 0.0)
    loss = jnp.sum((p - t) ** 2, axis=-1)
    if not sum_losses:
        loss = loss / jnp.maximum(seq_length.astype(jnp.float32), 1.0)
    return jnp.mean(loss)


if __name__ == "__main__":
    key = jax.random.PRNGKey(0)
    k1, k2, k3, k4, k5, k6 = jax.random.split(key, 6)

    # --- case 1: lane-aligned batch, auto tiles (2 row tiles x 1 T tile),
    #     bool mask passed through untouched, mean-normalized losses.
    B, T = 64, 256
    pred = jnp.exp(jax.random.normal(k1, (B, T), dtype=jnp.float32)) + 0.1
    true = jnp.exp(jax.random.normal(k2, (B, T), dtype=jnp.float32)) + 0.1
    mask = jax.random.bernoulli(k3, p=0.7, shape=(B, T))          # bool
    seq_length = jnp.sum(mask, axis=-1).astype(jnp.float32)

    out = jax.block_until_ready(msle_loss(pred, true, mask, seq_length,
                                          sum_losses=False))
    ref = _reference(pred, true, mask, seq_length, sum_losses=False)
    assert jnp.allclose(out, ref, rtol=1e-5, atol=1e-5), (out, ref)

    # --- case 2: ragged batch + sum_losses=True + forced even T tiling
    #     (exercises the accumulate-across-T path and ragged row blocks).
    B2 = 40
    out2 = jax.block_until_ready(
        msle_loss(pred[:B2], true[:B2], mask[:B2], seq_length[:B2],
                  sum_losses=True, row_tile=32, t_tile=128))
    ref2 = _reference(pred[:B2], true[:B2], mask[:B2], seq_length[:B2],
                      sum_losses=True)
    assert jnp.allclose(out2, ref2, rtol=1e-5, atol=1e-5), (out2, ref2)

    # --- case 3: ragged T tiling (T=160, t_tile=128) + float-mask convert path.
    B3, T3 = 16, 160
    pred3 = jnp.exp(jax.random.normal(k4, (B3, T3), dtype=jnp.float32)) + 0.1
    true3 = jnp.exp(jax.random.normal(k5, (B3, T3), dtype=jnp.float32)) + 0.1
    mask3 = jax.random.bernoulli(k6, p=0.6, shape=(B3, T3))
    seq3 = jnp.sum(mask3, axis=-1).astype(jnp.float32)
    out3 = jax.block_until_ready(
        msle_loss(pred3, true3, mask3.astype(jnp.float32), seq3,
                  sum_losses=False, t_tile=128))
    ref3 = _reference(pred3, true3, mask3, seq3, sum_losses=False)
    assert jnp.allclose(out3, ref3, rtol=1e-5, atol=1e-5), (out3, ref3)

    print("KERNEL_OK")
</pallas_src>

<mosaic_0001>
module attributes {stable_mosaic.version = 11 : i64} {
  func.func @_msle_kernel(%arg0: i32, %arg1: i32, %arg2: memref<32x256xf32, #tpu.memory_space<vmem>>, %arg3: memref<32x256xf32, #tpu.memory_space<vmem>>, %arg4: memref<32x256xi32, #tpu.memory_space<vmem>>, %arg5: memref<32x1xf32, #tpu.memory_space<vmem>>, %arg6: memref<32x1xf32, #tpu.memory_space<vmem>>) attributes {dimension_semantics = [#tpu.dimension_semantics<parallel>, #tpu.dimension_semantics<arbitrary>], iteration_bounds = array<i64: 2, 1>, scalar_prefetch = 0 : i64, scratch_operands = 0 : i64, tpu.core_type = #tpu.core_type<tc>, window_params = [{transform_indices = @transform_0, window_bounds = array<i64: 32, 256>}, {transform_indices = @transform_1, window_bounds = array<i64: 32, 256>}, {transform_indices = @transform_2, window_bounds = array<i64: 32, 256>}, {transform_indices = @transform_3, window_bounds = array<i64: 32, 1>}, {transform_indices = @transform_4, window_bounds = array<i64: 32, 1>}]} {
    %c0 = arith.constant 0 : index
    %c0_0 = arith.constant 0 : index
    %0 = vector.load %arg2[%c0, %c0_0] : memref<32x256xf32, #tpu.memory_space<vmem>>, vector<32x256xf32>
    %c0_1 = arith.constant 0 : index
    %c0_2 = arith.constant 0 : index
    %1 = vector.load %arg3[%c0_1, %c0_2] : memref<32x256xf32, #tpu.memory_space<vmem>>, vector<32x256xf32>
    %c0_3 = arith.constant 0 : index
    %c0_4 = arith.constant 0 : index
    %2 = vector.load %arg4[%c0_3, %c0_4] : memref<32x256xi32, #tpu.memory_space<vmem>>, vector<32x256xi32>
    %cst = arith.constant dense<0> : vector<32x256xi32>
    %3 = arith.cmpi ne, %2, %cst : vector<32x256xi32>
    %4 = math.log %0 : vector<32x256xf32>
    %5 = math.log %1 : vector<32x256xf32>
    %6 = arith.subf %4, %5 : vector<32x256xf32>
    %cst_5 = arith.constant 0.000000e+00 : f32
    %7 = vector.broadcast %cst_5 : f32 to vector<32x256xf32>
    %8 = arith.select %3, %6, %7 : vector<32x256xi1>, vector<32x256xf32>
    %9 = arith.mulf %8, %8 : vector<32x256xf32>
    %cst_6 = arith.constant dense<0.000000e+00> : vector<32xf32>
    %10 = vector.multi_reduction <add>, %9, %cst_6 [1] : vector<32x256xf32> to vector<32xf32>
    %11 = vector.shape_cast %10 : vector<32xf32> to vector<32x1xf32>
    %c0_i32 = arith.constant 0 : i32
    %12 = arith.cmpi eq, %arg1, %c0_i32 : i32
    %13 = arith.extui %12 : i1 to i32
    %c0_i32_7 = arith.constant 0 : i32
    %14 = arith.cmpi ne, %13, %c0_i32_7 : i32
    scf.if %14 {
      %cst_14 = arith.constant 0.000000e+00 : f32
      %21 = vector.broadcast %cst_14 : f32 to vector<32x1xf32>
      %c0_15 = arith.constant 0 : index
      %c0_16 = arith.constant 0 : index
      %22 = vector.load %arg6[%c0_15, %c0_16] : memref<32x1xf32, #tpu.memory_space<vmem>>, vector<32x1xf32>
      tpu.vector_store %arg6[%c0_15, %c0_16], %21 {strides = array<i32>} : memref<32x1xf32, #tpu.memory_space<vmem>>, vector<32x1xf32>,
    } else {
    }
    %c0_8 = arith.constant 0 : index
    %c0_9 = arith.constant 0 : index
    %15 = vector.load %arg6[%c0_8, %c0_9] : memref<32x1xf32, #tpu.memory_space<vmem>>, vector<32x1xf32>
    %16 = arith.addf %15, %11 : vector<32x1xf32>
    %c0_10 = arith.constant 0 : index
    %c0_11 = arith.constant 0 : index
    %17 = vector.load %arg6[%c0_10, %c0_11] : memref<32x1xf32, #tpu.memory_space<vmem>>, vector<32x1xf32>
    tpu.vector_store %arg6[%c0_10, %c0_11], %16 {strides = array<i32>} : memref<32x1xf32, #tpu.memory_space<vmem>>, vector<32x1xf32>,
    %c0_i32_12 = arith.constant 0 : i32
    %18 = arith.cmpi eq, %arg1, %c0_i32_12 : i32
    %19 = arith.extui %18 : i1 to i32
    %c0_i32_13 = arith.constant 0 : i32
    %20 = arith.cmpi ne, %19, %c0_i32_13 : i32
    scf.if %20 {
      %c0_14 = arith.constant 0 : index
      %c0_15 = arith.constant 0 : index
      %21 = vector.load %arg5[%c0_14, %c0_15] : memref<32x1xf32, #tpu.memory_space<vmem>>, vector<32x1xf32>
      %cst_16 = arith.constant 1.000000e+00 : f32
      %22 = vector.broadcast %cst_16 : f32 to vector<32x1xf32>
      %23 = arith.maximumf %21, %22 : vector<32x1xf32>
      %c0_17 = arith.constant 0 : index
      %c0_18 = arith.constant 0 : index
      %24 = vector.load %arg6[%c0_17, %c0_18] : memref<32x1xf32, #tpu.memory_space<vmem>>, vector<32x1xf32>
      %25 = arith.divf %24, %23 : vector<32x1xf32>
      %c0_19 = arith.constant 0 : index
      %c0_20 = arith.constant 0 : index
      %26 = vector.load %arg6[%c0_19, %c0_20] : memref<32x1xf32, #tpu.memory_space<vmem>>, vector<32x1xf32>
      tpu.vector_store %arg6[%c0_19, %c0_20], %25 {strides = array<i32>} : memref<32x1xf32, #tpu.memory_space<vmem>>, vector<32x1xf32>,
    } else {
    }
    return
  }
  func.func @transform_0(%arg0: i32, %arg1: i32) -> (i32, i32) {
    %c0_i32 = arith.constant 0 : i32
    return %arg0, %arg1 : i32, i32
  }
  func.func @transform_1(%arg0: i32, %arg1: i32) -> (i32, i32) {
    %c0_i32 = arith.constant 0 : i32
    return %arg0, %arg1 : i32, i32
  }
  func.func @transform_2(%arg0: i32, %arg1: i32) -> (i32, i32) {
    %c0_i32 = arith.constant 0 : i32
    return %arg0, %arg1 : i32, i32
  }
  func.func @transform_3(%arg0: i32, %arg1: i32) -> (i32, i32) {
    %c0_i32 = arith.constant 0 : i32
    %c0_i32_0 = arith.constant 0 : i32
    return %arg0, %c0_i32 : i32, i32
  }
  func.func @transform_4(%arg0: i32, %arg1: i32) -> (i32, i32) {
    %c0_i32 = arith.constant 0 : i32
    %c0_i32_0 = arith.constant 0 : i32
    return %arg0, %c0_i32 : i32, i32
  }
}

</mosaic_0001>

<bundles_post_ra>
// kernel: tpu_custom_call.1
= control target key start
LH: loop header
LB: loop body
LE: loop exit
PB: predicated region body
PF: predicated region fallthrough
CT: control target
= control target key end

     0   :  { %9 = vsyncpa [#allocation3], 0  ;;  %s1027_s0 = inlined_call_operand.vmem [shape: f32[64,256], index: 0, kind: input, shape index: {}]   ;;  %s1028_s1 = inlined_call_operand.hbm [shape: f32[64,256], index: 1, kind: input, shape index: {}]   ;;  %s1029_s2 = inlined_call_operand.vmem [shape: s32[64,256], index: 2, kind: input, shape index: {}]   ;;  %s1030_s3 = inlined_call_operand.vmem [shape: f32[64,1], index: 3, kind: input, shape index: {}]   ;;  %s1031_s4 = inlined_call_operand.vmem [shape: f32[64,1], index: 4, kind: output, shape index: {}]  }
   0x1   :  { %11 = vsyncpa [#allocation3 + $0x1], 0  ;;  %s851_s15 = smov 0   ;;  %s853_s16 = smov 0  }
   0x2   :  { %s855_s17 = smov 0   ;;  %s857_s18 = smov 0  }
   0x3   :  { %s859_s19 = smov 0   ;;  %s861_s20 = smov 0  }
   0x4 LB: > { %s618_s21 = sadd.s32 4294967295, %s820_s20   ;;  %s29_s22 = sadd.s32 1, %s816_s19  ;;  %s820_s20 = sphi %s861_s20, %s17_s20   ;;  %s816_s19 = sphi %s859_s19, %s1039_s19   ;;  %s812_s18 = sphi %s857_s18, %s1038_s18   ;;  %s808_s17 = sphi %s855_s17, %s1037_s17   ;;  %s804_s16 = sphi %s853_s16, %s1036_s16   ;;  %s800_s15 = sphi %s851_s15, %s1035_s15  }
   0x5   : > { %p31_p0 = scmp.ge.s32.totalorder %s29_s22, 2  ;;  %s66_s23 = sadd.s32 1, %s808_s17 }
   0x6   : > { %p73_p1 = scmp.ne.s32.totalorder %s808_s17, %s804_s16  ;;  %p74_p2 = scmp.eq.s32.totalorder %s820_s20, 0 }
   0x7   : > { %s1041_s22 = smov (%p31_p0, %s29_s22), 0  ;;  %p79_p4 = scmp.ne.s32.totalorder %s804_s16, %s800_s15 }
   0x8   : > { %p887_p3 = por %p74_p2, %p73_p1  ;;  %s61_s25 = ssub.s32 %s816_s19, %s1041_s22 }
   0x9   : > { %p80_p5 = scmp.eq.s32.totalorder %s618_s21, 0  ;;  %p64_p6 = scmp.eq.s32.totalorder %s61_s25, 0 }
   0xa   : > { %p650_p8 = scmp.lt.s32.totalorder %s820_s20, 2  ;;  %s198_s28 = sand.u32 1, %s808_s17  }
   0xb   : > { %p894_p7 = por %p80_p5, %p79_p4  ;;  %s641_s29 = sshll.u32 %s816_s19, 10 }
   0xc   : > { %s900_s27 = scalar_select %p64_p6, %s808_s17, %s66_s23  }
   0xd   : > { %s622_s30 = sshll.u32 %s198_s28, 6  ;;  %s211_s7 = scalar_lea.hbm %s1028_s1, %s641_s29 }
   0xe   : > { %s202_s8 = scalar_lea.vmem [#allocation2], %s622_s30  ;;  %p909_p9 = pnand %p650_p8, %p887_p3 }
   0xf   : > { %s212_s9 = sshll.u32 %s202_s8, 4  ;;  %s199_s11 = scalar_lea.sflag [#allocation3], %s198_s28  ;;  %s213_s9 = int_to_ptr.vmem [resolvable:$true] %s212_s9 }
  0x10   : > { %p744_p10 = pneg %p909_p9  ;;  %s755_s12 = scalar_lea.vmem %s213_s9, 1024 }
  0x11   : > { %p756_p11 = scmp.ne.s32.totalorder %s213_s9, %s755_s12  ;;  %s822_s13 = smov [#allocation2]  }
  0x12   : > { %s760_s14 = sshll.u32 %s822_s13, 4  ;;  %s761_s14 = int_to_ptr.vmem [resolvable:$false] %s760_s14 }
  0x13   : > { %p758_p12 = pnand %p756_p11, %p744_p10  ;;  %s762_s15 = scalar_lea.vmem %s761_s14, 2048 }
  0x14   : > { %p763_p0 = scmp.lt.s32.totalorder %s213_s9, %s761_s14  ;;  %p764_p1 = scmp.lt.s32.totalorder %s762_s15, %s755_s12 }
  0x15   : > { %p759_p13 = pneg %p758_p12 }
  0x16   : > { %p765_p2 = por %p764_p1, %p763_p0 }
  0x18   : > { %p766_p3 = pnand %p765_p2, %p759_p13 }
  0x1a   : > { %769 = shalt.err (!%p766_p3)
}
  0x1b   : > { %s823_s21 = smov 256   ;;  %s824_s23 = smov 16  }
  0x1c   : > { %649 = dma.hbm_to_vmem [thread:$0]  (!%p909_p9), %s211_s7, 1024, %s213_s9, %s199_s11, %s823_s21, %s823_s21, %s824_s23  }
  0x1d   : > { %p626_p4 = scmp.ge.s32.totalorder %s820_s20, 1  ;;  %p244_p5 = scmp.lt.s32.totalorder %s820_s20, 3 }
  0x1f   : > { %p245_p6 = pnand %p626_p4, %p244_p5 }
  0x20   : > { %s250_s24 = sand.u32 (!%p245_p6), 1, %s804_s16  }
  0x21   : > { %248 = sbr.rel (%p245_p6) target bundleno = 235 (0xeb), region = 36  ;;  %s627_s25 = sshll.u32 (!%p245_p6), %s250_s24, 6 }
  0x22   : > { %s251_s28 = scalar_lea.sflag (!%p245_p6), [#allocation3], %s250_s24  ;;  %s920_s29 = scalar_lea.vmem (!%p245_p6), [#allocation2], %s627_s25 }
  0x26   : > { %795 = dma.done.wait (%p894_p7), %s251_s28, 1024  }
  0x27   : > { %797 = vsyncadd (%p894_p7), %s251_s28, 4294966272  ;;  %s628_s30 = sshll.u32 %s812_s18, 2  ;;  %vm446_vm0 = vcmask 7168   ;;  %v350_v2 = vld [vmem:[%s920_s29] sm:$0xff]  ;;  %v351_v3 = vld [vmem:[%s920_s29 + $0x8] sm:$0xff]  ;;  %v825_v4 = vmov 0.0  }
  0x28   : > { %p306_p8 = scmp.lt.s32.totalorder %s628_s30, 7  ;;  %v354_v7 = vld [vmem:[%s920_s29 + $0x20] sm:$0xff]  ;;  %v355_v8 = vld [vmem:[%s920_s29 + $0x28] sm:$0xff]  ;;  %v352_v11 = vld [vmem:[%s920_s29 + $0x10] sm:$0xff] }
  0x29   : > { %v353_v12 = vld [vmem:[%s920_s29 + $0x18] sm:$0xff]  ;;  %v356_v22 = vld [vmem:[%s920_s29 + $0x30] sm:$0xff] }
  0x2a   : > { %s1043_s30 = smov (!%p306_p8, %s628_s30), 7  ;;  %v357_v25 = vld [vmem:[%s920_s29 + $0x38] sm:$0xff] }
  0x2b   : > { %s642_s5 = sshll.u32 %s1043_s30, 4  ;;  %s635_s6 = sshll.u32 %s1043_s30, 3 }
  0x2c   : > { %s934_s9 = scalar_lea.vmem %s1027_s0, %s642_s5  ;;  %s941_s18 = scalar_lea.vmem %s1031_s4, %s635_s6 }
  0x2d   : > { %v342_v0 = vld [vmem:[%s934_s9] sm:$0xff]  ;;  %v343_v1 = vld [vmem:[%s934_s9 + $0x8] sm:$0xff]  ;;  %447 = vst.msk [vmem:[%s941_s18] sm:$0xff] %vm446_vm0, %v825_v4  ;;  %448 = vst.msk [vmem:[%s941_s18 + $0x8] sm:$0xff] %vm446_vm0, %v825_v4  ;;  %s964_s13 = scalar_lea.vmem %s1029_s2, %s642_s5  ;;  %s334_s21 = scalar_lea.vmem %s1030_s3, %s635_s6 }
  0x2e   : > { %702 = vlog2.f32 %v342_v0  ;;  %449 = vst.msk [vmem:[%s941_s18 + $0x10] sm:$0xff] %vm446_vm0, %v825_v4  ;;  %450 = vst.msk [vmem:[%s941_s18 + $0x18] sm:$0xff] %vm446_vm0, %v825_v4  ;;  %v346_v5 = vld [vmem:[%s934_s9 + $0x20] sm:$0xff]  ;;  %v347_v6 = vld [vmem:[%s934_s9 + $0x28] sm:$0xff] }
  0x2f   : > { %704 = vlog2.f32 %v343_v1  ;;  %v344_v9 = vld [vmem:[%s934_s9 + $0x10] sm:$0xff]  ;;  %v345_v10 = vld [vmem:[%s934_s9 + $0x18] sm:$0xff]  ;;  %v358_v16 = vld [vmem:[%s964_s13] sm:$0xff] }
  0x30   : > { %706 = vlog2.f32 %v350_v2  ;;  %v348_v14 = vld [vmem:[%s934_s9 + $0x30] sm:$0xff]  ;;  %v349_v18 = vld [vmem:[%s934_s9 + $0x38] sm:$0xff]  ;;  %v359_v20 = vld [vmem:[%s964_s13 + $0x8] sm:$0xff]  ;;  %vm366_vm1 = vcmp.ne.s32.totalorder %v358_v16, 0 }
  0x31   : > { %708 = vlog2.f32 %v351_v3  ;;  %vm367_vm2 = vcmp.ne.s32.totalorder %v359_v20, 0  ;;  %v362_v35 = vld [vmem:[%s964_s13 + $0x20] sm:$0xff]  ;;  %v363_v38 = vld [vmem:[%s964_s13 + $0x28] sm:$0xff]  ;;  %v360_v47 = vld [vmem:[%s964_s13 + $0x10] sm:$0xff] }
  0x32   : > { %710 = vlog2.f32 %v346_v5  ;;  %vm370_vm3 = vcmp.ne.s32.totalorder %v362_v35, 0  ;;  %vm371_vm4 = vcmp.ne.s32.totalorder %v363_v38, 0  ;;  %v361_v51 = vld [vmem:[%s964_s13 + $0x18] sm:$0xff]  ;;  %vm368_vm5 = vcmp.ne.s32.totalorder %v360_v47, 0  ;;  %v364_v63 = vld [vmem:[%s964_s13 + $0x30] sm:$0xff] }
  0x33   : > { %712 = vlog2.f32 %v347_v6  ;;  %vm369_vm6 = vcmp.ne.s32.totalorder %v361_v51, 0  ;;  %v365_v3 = vld [vmem:[%s964_s13 + $0x38] sm:$0xff]  ;;  %vm372_vm7 = vcmp.ne.s32.totalorder %v364_v63, 0 }
  0x34   : > { %714 = vlog2.f32 %v354_v7  ;;  %vm373_vm8 = vcmp.ne.s32.totalorder %v365_v3, 0 }
  0x35   : > { %716 = vlog2.f32 %v355_v8 }
  0x36   : > { %718 = vlog2.f32 %v344_v9 }
  0x37   : > { %720 = vlog2.f32 %v345_v10 }
  0x38   : > { %722 = vlog2.f32 %v352_v11 }
  0x39   : > { %724 = vlog2.f32 %v353_v12 }
  0x3a   : > { %726 = vlog2.f32 %v348_v14 }
  0x3b   : > { %v703_v13 = vpop.eup %702  ;;  %728 = vlog2.f32 %v349_v18 }
  0x3c   : > { %v705_v15 = vpop.eup %704  ;;  %v375_v17 = vmul.f32 0.6931472, %v703_v13  ;;  %730 = vlog2.f32 %v356_v22 }
  0x3d   : > { %v707_v19 = vpop.eup %706  ;;  %v377_v21 = vmul.f32 0.6931472, %v705_v15  ;;  %732 = vlog2.f32 %v357_v25  ;;  %v454_v25 = vld [vmem:[%s941_s18 + $0x18] sm:$0xff] }
  0x3e   : > { %v709_v23 = vpop.eup %708  ;;  %v391_v24 = vmul.f32 0.6931472, %v707_v19 }
  0x3f   : > { %v393_v26 = vmul.f32 0.6931472, %v709_v23  ;;  %v711_v30 = vpop.eup %710  ;;  %v453_v23 = vld [vmem:[%s941_s18 + $0x10] sm:$0xff] }
  0x40   : > { %v406_v27 = vsub.f32 %v375_v17, %v391_v24  ;;  %v713_v33 = vpop.eup %712  ;;  %v383_v36 = vmul.f32 0.6931472, %v711_v30  ;;  %v452_v24 = vld [vmem:[%s941_s18 + $0x8] sm:$0xff] }
  0x41   : > { %v407_v28 = vsub.f32 %v377_v21, %v393_v26  ;;  %v715_v37 = vpop.eup %714  ;;  %v385_v39 = vmul.f32 0.6931472, %v713_v33  ;;  %v451_v21 = vld [vmem:[%s941_s18] sm:$0xff] }
  0x42   : > { %v414_v29 = vsel %vm366_vm1, %v406_v27, 0.0  ;;  %v717_v40 = vpop.eup %716  ;;  %v399_v42 = vmul.f32 0.6931472, %v715_v37  ;;  %v467_v27 = vld [vmem:[%s334_s21] sm:$0xff] }
  0x43   : > { %v415_v31 = vsel %vm367_vm2, %v407_v28, 0.0  ;;  %v422_v32 = vmul.f32 %v414_v29, %v414_v29  ;;  %v719_v43 = vpop.eup %718  ;;  %v401_v44 = vmul.f32 0.6931472, %v717_v40  ;;  %v468_v28 = vld [vmem:[%s334_s21 + $0x8] sm:$0xff]  ;;  %v469_v29 = vld [vmem:[%s334_s21 + $0x10] sm:$0xff]  ;;  %v471_v30 = vmax.f32 %v467_v27, 1.0 }
  0x44   : > { %v423_v34 = vmul.f32 %v415_v31, %v415_v31  ;;  %v721_v45 = vpop.eup %720  ;;  %v410_v46 = vsub.f32 %v383_v36, %v399_v42  ;;  %v379_v48 = vmul.f32 0.6931472, %v719_v43  ;;  %v470_v31 = vld [vmem:[%s334_s21 + $0x18] sm:$0xff]  ;;  %v473_v33 = vmax.f32 %v469_v29, 1.0 }
  0x45   : > { %v723_v49 = vpop.eup %722  ;;  %v411_v50 = vsub.f32 %v385_v39, %v401_v44  ;;  %v381_v52 = vmul.f32 0.6931472, %v721_v45  ;;  %734 = vrcp.f32 %v471_v30 }
  0x46   : > { %v430_v41 = vadd.f32 %v423_v34, %v422_v32  ;;  %v725_v53 = vpop.eup %724  ;;  %v418_v54 = vsel %vm370_vm3, %v410_v46, 0.0  ;;  %v395_v55 = vmul.f32 0.6931472, %v723_v49  ;;  %v472_v32 = vmax.f32 %v468_v28, 1.0 }
  0x47   : > { %v727_v56 = vpop.eup %726  ;;  %v419_v57 = vsel %vm371_vm4, %v411_v50, 0.0  ;;  %v426_v58 = vmul.f32 %v418_v54, %v418_v54  ;;  %v397_v59 = vmul.f32 0.6931472, %v725_v53  ;;  %v474_v34 = vmax.f32 %v470_v31, 1.0 }
  0x48   : > { %431 = vadd.xlane.f32.xlu0 %v430_v41  ;;  %v729_v60 = vpop.eup %728  ;;  %v427_v61 = vmul.f32 %v419_v57, %v419_v57  ;;  %v408_v62 = vsub.f32 %v379_v48, %v395_v55  ;;  %v387_v0 = vmul.f32 0.6931472, %v727_v56  ;;  %736 = vrcp.f32 %v472_v32 }
  0x49   : > { %v731_v1 = vpop.eup %730  ;;  %v409_v2 = vsub.f32 %v381_v52, %v397_v59  ;;  %v389_v4 = vmul.f32 0.6931472, %v729_v60  ;;  %738 = vrcp.f32 %v473_v33 }
  0x4a   : > { %v733_v5 = vpop.eup %732  ;;  %v436_v6 = vadd.f32 %v427_v61, %v426_v58  ;;  %v416_v7 = vsel %vm368_vm5, %v408_v62, 0.0  ;;  %v403_v8 = vmul.f32 0.6931472, %v731_v1  ;;  %740 = vrcp.f32 %v474_v34 }
  0x4b   : > { %v417_v9 = vsel %vm369_vm6, %v409_v2, 0.0  ;;  %v424_v10 = vmul.f32 %v416_v7, %v416_v7  ;;  %v405_v11 = vmul.f32 0.6931472, %v733_v5 }
  0x4c   : > { %437 = vadd.xlane.f32.xlu1 %v436_v6  ;;  %v425_v12 = vmul.f32 %v417_v9, %v417_v9  ;;  %v412_v13 = vsub.f32 %v387_v0, %v403_v8 }
  0x4d   : > { %v413_v14 = vsub.f32 %v389_v4, %v405_v11 }
  0x4e   : > { %v433_v15 = vadd.f32 %v425_v12, %v424_v10  ;;  %v420_v16 = vsel %vm372_vm7, %v412_v13, 0.0 }
  0x4f   : > { %v421_v17 = vsel %vm373_vm8, %v413_v14, 0.0  ;;  %v428_v18 = vmul.f32 %v420_v16, %v420_v16 }
  0x50   : > { %434 = vadd.xlane.f32.xlu0 %v433_v15  ;;  %v429_v19 = vmul.f32 %v421_v17, %v421_v17 }
  0x52   : > { %v439_v20 = vadd.f32 %v429_v19, %v428_v18  ;;  %v735_v41 = vpop.eup %734 }
  0x54   : > { %440 = vadd.xlane.f32.xlu1 %v439_v20 }
  0x55   : > { %v737_v42 = vpop.eup %736 }
  0x56   : > { %v739_v43 = vpop.eup %738 }
  0x57   : > { %v741_v47 = vpop.eup %740 }
  0xd1   : > { %v432_v22 = vpop.xlane.xlu0 %431 }
  0xd2   : > { %v455_v26 = vadd.f32 %v451_v21, %v432_v22 }
  0xd4   : > { %460 = vst.msk [vmem:[%s941_s18] sm:$0xff] %vm446_vm0, %v455_v26 }
  0xd5   : > { %v438_v35 = vpop.xlane.xlu1 %437 }
  0xd6   : > { %v457_v38 = vadd.f32 %v453_v23, %v438_v35 }
  0xd8   : > { %462 = vst.msk [vmem:[%s941_s18 + $0x10] sm:$0xff] %vm446_vm0, %v457_v38 }
  0xd9   : > { %v435_v36 = vpop.xlane.xlu0 %434 }
  0xda   : > { %v456_v37 = vadd.f32 %v452_v24, %v435_v36 }
  0xdb   : > { %v475_v44 = vld [vmem:[%s941_s18] sm:$0xff] }
  0xdc   : > { %461 = vst.msk [vmem:[%s941_s18 + $0x8] sm:$0xff] %vm446_vm0, %v456_v37  ;;  %v480_v49 = vmul.f32 %v735_v41, %v475_v44 }
  0xdd   : > { %v441_v39 = vpop.xlane.xlu1 %440 }
  0xde   : > { %v458_v40 = vadd.f32 %v454_v25, %v441_v39  ;;  %487 = vst.msk [vmem:[%s941_s18] sm:$0xff] %vm446_vm0, %v480_v49 }
  0xdf   : > { %v477_v46 = vld [vmem:[%s941_s18 + $0x10] sm:$0xff] }
  0xe0   : > { %463 = vst.msk [vmem:[%s941_s18 + $0x18] sm:$0xff] %vm446_vm0, %v458_v40  ;;  %v484_v51 = vmul.f32 %v739_v43, %v477_v46 }
  0xe2   : > { %489 = vst.msk [vmem:[%s941_s18 + $0x10] sm:$0xff] %vm446_vm0, %v484_v51 }
  0xe3   : > { %v476_v45 = vld [vmem:[%s941_s18 + $0x8] sm:$0xff] }
  0xe4   : > { %v482_v50 = vmul.f32 %v737_v42, %v476_v45 }
  0xe6   : > { %488 = vst.msk [vmem:[%s941_s18 + $0x8] sm:$0xff] %vm446_vm0, %v482_v50 }
  0xe7   : > { %v478_v48 = vld [vmem:[%s941_s18 + $0x18] sm:$0xff] }
  0xe8   : > { %v486_v52 = vmul.f32 %v741_v47, %v478_v48 }
  0xea   : > { %490 = vst.msk [vmem:[%s941_s18 + $0x18] sm:$0xff] %vm446_vm0, %v486_v52 }
  0xeb PF: > { %s17_s20 = sadd.s32 1, %s820_s20   ;;  %s1035_s15 = smov %s804_s16 }
  0xec   : > { %p14_p7 = scmp.ge.s32.totalorder %s17_s20, 4   ;;  %s1036_s16 = smov %s808_s17 }
  0xed   : > { %s1037_s17 = smov %s900_s27  ;;  %s1038_s18 = smov %s816_s19 }
  0xee   : > { %s1039_s19 = smov %s1041_s22  ;;  %16 = sbr.rel (!%p14_p7) target bundleno = 4 (0x4), region = 93 }
  0xf3   :  { %513 = vsyncpa [#allocation3], 1 }
  0xf4   :  { %515 = vsyncpa [#allocation3 + $0x1], 1 }

</bundles_post_ra>
